<compile_context>
chip_gen: v7x
topology: tpu7x:2x2x1
jax: 0.10.0
libtpu: 0.0.40
codegen_flags: <defaults>
</compile_context>

<pallas_src>
import jax
import jax.numpy as jnp
from jax.experimental import pallas as pl
from jax.experimental.pallas import tpu as pltpu

LANE = 128          # vreg lane width; hidden/action dims padded to this
NEG_INF = -1e30     # bias for padded logit columns -> exp() underflows to 0


def _round_up(n, m):
    return ((n + m - 1) // m) * m


def policy_net_kernel(x_ref, w1_ref, b1_ref, w2_ref, b2_ref, w3_ref, b3_ref, o_ref):
    """Fused forward for one batch tile: (Linear+ReLU) x2, Linear, softmax."""
    # x arrives at its true feature width (no wrapper-side pad); cast to bf16
    # in-kernel for the MXU.  All accumulation / bias / ReLU / softmax is f32.
    x = x_ref[...].astype(jnp.bfloat16)

    # Layer 1
    h1 = jnp.dot(x, w1_ref[...], preferred_element_type=jnp.float32) + b1_ref[...]
    h1 = jnp.maximum(h1, 0.0)

    # Layer 2
    h2 = jnp.dot(h1.astype(jnp.bfloat16), w2_ref[...],
                 preferred_element_type=jnp.float32) + b2_ref[...]
    h2 = jnp.maximum(h2, 0.0)

    # Layer 3 (logits). Padded columns come out as 0 + (-1e30) = -1e30.
    logits = jnp.dot(h2.astype(jnp.bfloat16), w3_ref[...],
                     preferred_element_type=jnp.float32) + b3_ref[...]

    # Numerically-stable softmax over the (padded) action dim; padded columns
    # contribute exp(-1e30 - m) == 0, so the real-action softmax is exact.
    m = jnp.max(logits, axis=-1, keepdims=True)
    e = jnp.exp(logits - m)
    denom = jnp.sum(e, axis=-1, keepdims=True)
    probs = e / denom                       # exact f32 divide (not approx vrcp)

    # bf16 store: halves HBM writeback; 128-lane block keeps it unmasked/dense.
    o_ref[...] = probs.astype(o_ref.dtype)


def init_params(key, state_dim, hidden_dim, action_dim):
    """nn.Linear-style U(-1/sqrt(fan_in)) init, stored as (in, out) f32."""
    ks = jax.random.split(key, 6)

    def linear(kw, kb, fan_in, fan_out):
        bound = 1.0 / float(fan_in) ** 0.5
        w = jax.random.uniform(kw, (fan_in, fan_out), jnp.float32, -bound, bound)
        b = jax.random.uniform(kb, (1, fan_out), jnp.float32, -bound, bound)
        return w, b

    w1, b1 = linear(ks[0], ks[1], state_dim, hidden_dim)
    w2, b2 = linear(ks[2], ks[3], hidden_dim, hidden_dim)
    w3, b3 = linear(ks[4], ks[5], hidden_dim, action_dim)
    return {"w1": w1, "b1": b1, "w2": w2, "b2": b2, "w3": w3, "b3": b3}


def pad_params(params, state_dim, hidden_dim, action_dim):
    """Pad hidden/action dims to 128 lanes; weights -> bf16, biases -> f32.
    w1 keeps its TRUE input width (state_dim) so x needs no feature pad.
    Padded logit columns get bias NEG_INF so they vanish from the softmax."""
    H = _round_up(hidden_dim, LANE)
    A = _round_up(action_dim, LANE)
    bf = jnp.bfloat16

    w1 = jnp.zeros((state_dim, H), bf).at[:, :hidden_dim].set(params["w1"].astype(bf))
    b1 = jnp.zeros((1, H), jnp.float32).at[:, :hidden_dim].set(params["b1"])
    w2 = jnp.zeros((H, H), bf).at[:hidden_dim, :hidden_dim].set(params["w2"].astype(bf))
    b2 = jnp.zeros((1, H), jnp.float32).at[:, :hidden_dim].set(params["b2"])
    w3 = jnp.zeros((H, A), bf).at[:hidden_dim, :action_dim].set(params["w3"].astype(bf))
    b3 = jnp.full((1, A), NEG_INF, jnp.float32).at[:, :action_dim].set(params["b3"])

    return {"w1": w1, "b1": b1, "w2": w2, "b2": b2, "w3": w3, "b3": b3,
            "state_dim": state_dim, "action_dim": action_dim}


def policy_net_forward(x, padded, *, rows_per_step=32768):
    """x: (B, state_dim) f32. Returns (B, action_dim) bf16 softmax probabilities."""
    B, S = x.shape
    action_dim = padded["action_dim"]
    w1, b1, w2, b2, w3, b3 = (padded[k] for k in ("w1", "b1", "w2", "b2", "w3", "b3"))
    A_pad = w3.shape[1]

    # Grid sizing: one step unless the batch tile would blow the VMEM budget.
    # Multi-step uses an EVEN step count so the "parallel" axis load-balances
    # across v7x's 2 TensorCores; tiles are multiples of 16 rows (bf16 packing).
    if B <= rows_per_step:
        steps, tb, B_pad = 1, B, B          # block == full array: no batch pad
        xp = x
    else:
        steps = 2 * (-(-B // (2 * rows_per_step)))      # even number of steps
        tb = _round_up(-(-B // steps), 16)
        B_pad = tb * steps
        xp = x if B_pad == B else jnp.zeros((B_pad, S), x.dtype).at[:B].set(x)

    # Weights/biases: full-array blocks with constant index_map -> VMEM-resident
    # across all grid steps (no per-tile re-DMA of the parameters).
    resident = lambda a: pl.BlockSpec(a.shape, lambda i: (0, 0))

    out = pl.pallas_call(
        policy_net_kernel,
        out_shape=jax.ShapeDtypeStruct((B_pad, A_pad), jnp.bfloat16),
        grid=(steps,),
        in_specs=[
            pl.BlockSpec((tb, S), lambda i: (i, 0)),   # x at its true feature width
            resident(w1), resident(b1),
            resident(w2), resident(b2),
            resident(w3), resident(b3),
        ],
        out_specs=pl.BlockSpec((tb, A_pad), lambda i: (i, 0)),
        compiler_params=pltpu.CompilerParams(
            dimension_semantics=("parallel",),         # megacore-shardable batch axis
        ),
    )(xp, w1, b1, w2, b2, w3, b3)

    # Consumers that can read the padded (B, 128) bf16 block directly may skip
    # this slice; the demo wants the exact (B, action_dim) policy.
    return out[:B, :action_dim]


if __name__ == "__main__":
    batch, state_dim, hidden_dim, action_dim = 64, 4, 32, 6

    key = jax.random.PRNGKey(0)
    k_params, k_x = jax.random.split(key)

    params = init_params(k_params, state_dim, hidden_dim, action_dim)
    padded = pad_params(params, state_dim, hidden_dim, action_dim)
    x = jax.random.normal(k_x, (batch, state_dim), dtype=jnp.float32)

    # Default sizing -> single grid step (the perf-optimal configuration here).
    out = policy_net_forward(x, padded)
    out = jax.block_until_ready(out)

    # Pure-JAX f32 reference (matches the PyTorch module's forward).
    def ref(x, p):
        h1 = jnp.maximum(x @ p["w1"] + p["b1"], 0.0)
        h2 = jnp.maximum(h1 @ p["w2"] + p["b2"], 0.0)
        return jax.nn.softmax(h2 @ p["w3"] + p["b3"], axis=1)

    expected = ref(x, params)
    out_f32 = out.astype(jnp.float32)

    assert out.shape == (batch, action_dim)
    assert out.dtype == jnp.bfloat16
    assert jnp.allclose(jnp.sum(out_f32, axis=1), 1.0, atol=1e-2)   # rows sum to 1
    assert jnp.allclose(out_f32, expected, atol=2e-2)               # bf16 tolerance

    print("KERNEL_OK")
</pallas_src>

<mosaic_0001>
module attributes {stable_mosaic.version = 11 : i64} {
  func.func @policy_net_kernel(%arg0: i32, %arg1: memref<64x4xf32, #tpu.memory_space<vmem>>, %arg2: memref<4x128xbf16, #tpu.memory_space<vmem>>, %arg3: memref<1x128xf32, #tpu.memory_space<vmem>>, %arg4: memref<128x128xbf16, #tpu.memory_space<vmem>>, %arg5: memref<1x128xf32, #tpu.memory_space<vmem>>, %arg6: memref<128x128xbf16, #tpu.memory_space<vmem>>, %arg7: memref<1x128xf32, #tpu.memory_space<vmem>>, %arg8: memref<64x128xbf16, #tpu.memory_space<vmem>>) attributes {dimension_semantics = [#tpu.dimension_semantics<parallel>], iteration_bounds = array<i64: 1>, scalar_prefetch = 0 : i64, scratch_operands = 0 : i64, tpu.core_type = #tpu.core_type<tc>, window_params = [{transform_indices = @transform_0, window_bounds = array<i64: 64, 4>}, {pipeline_mode = #tpu.pipeline_mode<synchronous>, transform_indices = @transform_1, window_bounds = array<i64: 4, 128>}, {pipeline_mode = #tpu.pipeline_mode<synchronous>, transform_indices = @transform_2, window_bounds = array<i64: 1, 128>}, {pipeline_mode = #tpu.pipeline_mode<synchronous>, transform_indices = @transform_3, window_bounds = array<i64: 128, 128>}, {pipeline_mode = #tpu.pipeline_mode<synchronous>, transform_indices = @transform_4, window_bounds = array<i64: 1, 128>}, {pipeline_mode = #tpu.pipeline_mode<synchronous>, transform_indices = @transform_5, window_bounds = array<i64: 128, 128>}, {pipeline_mode = #tpu.pipeline_mode<synchronous>, transform_indices = @transform_6, window_bounds = array<i64: 1, 128>}, {transform_indices = @transform_7, window_bounds = array<i64: 64, 128>}]} {
    %c0 = arith.constant 0 : index
    %c0_0 = arith.constant 0 : index
    %0 = vector.load %arg1[%c0, %c0_0] : memref<64x4xf32, #tpu.memory_space<vmem>>, vector<64x4xf32>
    %1 = arith.truncf %0 : vector<64x4xf32> to vector<64x4xbf16>
    %c0_1 = arith.constant 0 : index
    %c0_2 = arith.constant 0 : index
    %2 = vector.load %arg2[%c0_1, %c0_2] : memref<4x128xbf16, #tpu.memory_space<vmem>>, vector<4x128xbf16>
    %cst = arith.constant dense<0.000000e+00> : vector<64x128xf32>
    %3 = tpu.matmul %1, %2, %cst {dimension_numbers = #tpu.dot_dimension_numbers<[1], [0], [0], [1], [0, 0, 1, 1], [], []>} : vector<64x4xbf16>, vector<4x128xbf16>, vector<64x128xf32> -> vector<64x128xf32>
    %c0_3 = arith.constant 0 : index
    %c0_4 = arith.constant 0 : index
    %4 = vector.load %arg3[%c0_3, %c0_4] : memref<1x128xf32, #tpu.memory_space<vmem>>, vector<1x128xf32>
    %5 = vector.broadcast %4 : vector<1x128xf32> to vector<64x128xf32>
    %6 = arith.addf %3, %5 : vector<64x128xf32>
    %cst_5 = arith.constant 0.000000e+00 : f32
    %7 = vector.broadcast %cst_5 : f32 to vector<64x128xf32>
    %8 = arith.maximumf %6, %7 : vector<64x128xf32>
    %9 = arith.truncf %8 : vector<64x128xf32> to vector<64x128xbf16>
    %c0_6 = arith.constant 0 : index
    %c0_7 = arith.constant 0 : index
    %10 = vector.load %arg4[%c0_6, %c0_7] : memref<128x128xbf16, #tpu.memory_space<vmem>>, vector<128x128xbf16>
    %cst_8 = arith.constant dense<0.000000e+00> : vector<64x128xf32>
    %11 = tpu.matmul %9, %10, %cst_8 {dimension_numbers = #tpu.dot_dimension_numbers<[1], [0], [0], [1], [0, 0, 1, 1], [], []>} : vector<64x128xbf16>, vector<128x128xbf16>, vector<64x128xf32> -> vector<64x128xf32>
    %c0_9 = arith.constant 0 : index
    %c0_10 = arith.constant 0 : index
    %12 = vector.load %arg5[%c0_9, %c0_10] : memref<1x128xf32, #tpu.memory_space<vmem>>, vector<1x128xf32>
    %13 = vector.broadcast %12 : vector<1x128xf32> to vector<64x128xf32>
    %14 = arith.addf %11, %13 : vector<64x128xf32>
    %cst_11 = arith.constant 0.000000e+00 : f32
    %15 = vector.broadcast %cst_11 : f32 to vector<64x128xf32>
    %16 = arith.maximumf %14, %15 : vector<64x128xf32>
    %17 = arith.truncf %16 : vector<64x128xf32> to vector<64x128xbf16>
    %c0_12 = arith.constant 0 : index
    %c0_13 = arith.constant 0 : index
    %18 = vector.load %arg6[%c0_12, %c0_13] : memref<128x128xbf16, #tpu.memory_space<vmem>>, vector<128x128xbf16>
    %cst_14 = arith.constant dense<0.000000e+00> : vector<64x128xf32>
    %19 = tpu.matmul %17, %18, %cst_14 {dimension_numbers = #tpu.dot_dimension_numbers<[1], [0], [0], [1], [0, 0, 1, 1], [], []>} : vector<64x128xbf16>, vector<128x128xbf16>, vector<64x128xf32> -> vector<64x128xf32>
    %c0_15 = arith.constant 0 : index
    %c0_16 = arith.constant 0 : index
    %20 = vector.load %arg7[%c0_15, %c0_16] : memref<1x128xf32, #tpu.memory_space<vmem>>, vector<1x128xf32>
    %21 = vector.broadcast %20 : vector<1x128xf32> to vector<64x128xf32>
    %22 = arith.addf %19, %21 : vector<64x128xf32>
    %cst_17 = arith.constant dense<0xFF800000> : vector<64xf32>
    %23 = vector.multi_reduction <maximumf>, %22, %cst_17 [1] : vector<64x128xf32> to vector<64xf32>
    %24 = vector.shape_cast %23 : vector<64xf32> to vector<64x1xf32>
    %25 = vector.broadcast %24 : vector<64x1xf32> to vector<64x128xf32>
    %26 = arith.subf %22, %25 : vector<64x128xf32>
    %27 = math.exp %26 : vector<64x128xf32>
    %cst_18 = arith.constant dense<0.000000e+00> : vector<64xf32>
    %28 = vector.multi_reduction <add>, %27, %cst_18 [1] : vector<64x128xf32> to vector<64xf32>
    %29 = vector.shape_cast %28 : vector<64xf32> to vector<64x1xf32>
    %30 = vector.broadcast %29 : vector<64x1xf32> to vector<64x128xf32>
    %31 = arith.divf %27, %30 : vector<64x128xf32>
    %32 = arith.truncf %31 : vector<64x128xf32> to vector<64x128xbf16>
    %c0_19 = arith.constant 0 : index
    %c0_20 = arith.constant 0 : index
    %33 = vector.load %arg8[%c0_19, %c0_20] : memref<64x128xbf16, #tpu.memory_space<vmem>>, vector<64x128xbf16>
    tpu.vector_store %arg8[%c0_19, %c0_20], %32 {strides = array<i32>} : memref<64x128xbf16, #tpu.memory_space<vmem>>, vector<64x128xbf16>,
    return
  }
  func.func @transform_0(%arg0: i32) -> (i32, i32) {
    %c0_i32 = arith.constant 0 : i32
    %c0_i32_0 = arith.constant 0 : i32
    return %arg0, %c0_i32 : i32, i32
  }
  func.func @transform_1(%arg0: i32) -> (i32, i32) {
    %c0_i32 = arith.constant 0 : i32
    %c0_i32_0 = arith.constant 0 : i32
    %c0_i32_1 = arith.constant 0 : i32
    return %c0_i32, %c0_i32_0 : i32, i32
  }
  func.func @transform_2(%arg0: i32) -> (i32, i32) {
    %c0_i32 = arith.constant 0 : i32
    %c0_i32_0 = arith.constant 0 : i32
    %c0_i32_1 = arith.constant 0 : i32
    return %c0_i32, %c0_i32_0 : i32, i32
  }
  func.func @transform_3(%arg0: i32) -> (i32, i32) {
    %c0_i32 = arith.constant 0 : i32
    %c0_i32_0 = arith.constant 0 : i32
    %c0_i32_1 = arith.constant 0 : i32
    return %c0_i32, %c0_i32_0 : i32, i32
  }
  func.func @transform_4(%arg0: i32) -> (i32, i32) {
    %c0_i32 = arith.constant 0 : i32
    %c0_i32_0 = arith.constant 0 : i32
    %c0_i32_1 = arith.constant 0 : i32
    return %c0_i32, %c0_i32_0 : i32, i32
  }
  func.func @transform_5(%arg0: i32) -> (i32, i32) {
    %c0_i32 = arith.constant 0 : i32
    %c0_i32_0 = arith.constant 0 : i32
    %c0_i32_1 = arith.constant 0 : i32
    return %c0_i32, %c0_i32_0 : i32, i32
  }
  func.func @transform_6(%arg0: i32) -> (i32, i32) {
    %c0_i32 = arith.constant 0 : i32
    %c0_i32_0 = arith.constant 0 : i32
    %c0_i32_1 = arith.constant 0 : i32
    return %c0_i32, %c0_i32_0 : i32, i32
  }
  func.func @transform_7(%arg0: i32) -> (i32, i32) {
    %c0_i32 = arith.constant 0 : i32
    %c0_i32_0 = arith.constant 0 : i32
    return %arg0, %c0_i32 : i32, i32
  }
}

</mosaic_0001>

<bundles_post_ra>
// kernel: tpu_custom_call.1
= control target key start
LH: loop header
LB: loop body
LE: loop exit
PB: predicated region body
PF: predicated region fallthrough
CT: control target
= control target key end

     0   :  { %12 = vsyncpa [#allocation3], 0  ;;  %s957_s0 = inlined_call_operand.vmem [shape: f32[64,4], index: 0, kind: input, shape index: {}]   ;;  %s958_s1 = inlined_call_operand.vmem [shape: bf16[4,128], index: 1, kind: input, shape index: {}]   ;;  %s959_s2 = inlined_call_operand.vmem [shape: f32[1,128], index: 2, kind: input, shape index: {}]   ;;  %s960_s3 = inlined_call_operand.vmem [shape: bf16[128,128], index: 3, kind: input, shape index: {}]   ;;  %s961_s4 = inlined_call_operand.vmem [shape: f32[1,128], index: 4, kind: input, shape index: {}]   ;;  %s962_s5 = inlined_call_operand.hbm [shape: bf16[128,128], index: 5, kind: input, shape index: {}]   ;;  %s963_s6 = inlined_call_operand.vmem [shape: f32[1,128], index: 6, kind: input, shape index: {}]   ;;  %s964_s7 = inlined_call_operand.hbm [shape: bf16[64,128], index: 7, kind: output, shape index: {}]  }
   0x1   :  { %13 = vsyncpa [#allocation4], 0  ;;  %s819_s24 = smov [#allocation2]   ;;  %s771_s28 = scalar_lea.hbm %s962_s5, 1024 }
   0x2   :  { %s29_s25 = sshll.u32 %s819_s24, 4  ;;  %p772_p0 = scmp.ne.s32.totalorder %s962_s5, %s771_s28  ;;  %s30_s25 = int_to_ptr.vmem [resolvable:$true] %s29_s25 }
   0x3   :  { %p775_p1 = scmp.lt.u32.totalorder %s771_s28, %s962_s5 }
   0x5   :  { %p777_p2 = pnand %p775_p1, %p772_p0 }
   0x7   :  { %780 = shalt.err (!%p777_p2)
}
   0x8   :  { %s781_s10 = scalar_lea.vmem %s30_s25, 1024  ;;  %p786_p4 = scmp.lt.s32.totalorder %s30_s25, %s30_s25 }
   0x9   :  { %p782_p3 = scmp.ne.s32.totalorder %s30_s25, %s781_s10  ;;  %p787_p5 = scmp.lt.s32.totalorder %s781_s10, %s781_s10 }
   0xb   :  { %p788_p6 = por %p787_p5, %p786_p4 }
   0xd   :  { %p789_p7 = pnand %p788_p6, %p782_p3 }
   0xf   :  { %792 = shalt.err (!%p789_p7)
}
  0x10   :  { %s820_s11 = smov 64   ;;  %s821_s12 = smov 4  }
  0x11   :  { %35 = dma.hbm_to_vmem [thread:$0]  %s962_s5, 1024, %s30_s25, [#allocation3], %s820_s11, %s820_s11, %s821_s12  }
  0x12   :  { %815 = dma.done.wait [#allocation3], 1024  }
  0x13   :  { %816 = vsyncadd [#allocation3], 4294966272  ;;  %vm75_vm0 = vcmask 1041408   ;;  %v54_v0 = vld [vmem:[%s958_s1] sm:$0x3]  ;;  %v43_v2 = vld [vmem:[%s957_s0 + $0x8] sm:$0xff] }
  0x14   :  { %v42_v1 = vld [vmem:[%s957_s0] sm:$0xff]  ;;  %vm62_vm1 = vcmask 31744   ;;  %718 = vmatprep.subr.msk.bf16.mxu0 %vm75_vm0, %v54_v0  ;;  %v77_v3 = vsel %vm75_vm0, %v54_v0, 0  ;;  %v44_v5 = vld [vmem:[%s957_s0 + $0x10] sm:$0xff]  ;;  %v45_v6 = vld [vmem:[%s957_s0 + $0x18] sm:$0xff] }
  0x15   :  { %v50_v4 = vpack.c.bf16 %v43_v2, %v42_v1  ;;  %v46_v7 = vld [vmem:[%s957_s0 + $0x20] sm:$0xff]  ;;  %661 = vmatpush3.bf16.msra.mxu0 %v77_v3  ;;  %v51_v8 = vpack.c.bf16 %v45_v6, %v44_v5  ;;  %v47_v9 = vld [vmem:[%s957_s0 + $0x28] sm:$0xff]  ;;  %v48_v13 = vld [vmem:[%s957_s0 + $0x30] sm:$0xff] }
  0x16   :  { %v52_v10 = vpack.c.bf16 %v47_v9, %v46_v7  ;;  %v723_v11 = vld [vmem:[%s960_s3] sm:$0xff]   ;;  %v724_v12 = vld [vmem:[%s960_s3 + $0x8] sm:$0xff]   ;;  %v49_v14 = vld [vmem:[%s957_s0 + $0x38] sm:$0xff] }
  0x17   :  { %662 = vmatprep.mubr.msk.bf16.mxu0 %vm62_vm1, %v50_v4  ;;  %670 = vmatprep.subr.bf16.mxu1 %v723_v11  ;;  %v725_v15 = vld [vmem:[%s960_s3 + $0x10] sm:$0xff]   ;;  %v53_v16 = vpack.c.bf16 %v49_v14, %v48_v13  ;;  %v726_v17 = vld [vmem:[%s960_s3 + $0x18] sm:$0xff]   ;;  %v727_v18 = vld [vmem:[%s960_s3 + $0x20] sm:$0xff]  }
  0x18   :  { %663 = vmatmul.mubr.msk.bf16.vlgmr.msra.gmra.mrb[0].mxu0 %vm62_vm1, %v51_v8  ;;  %671 = vmatpush3.bf16.msra.mxu1 %v723_v11  ;;  %v728_v19 = vld [vmem:[%s960_s3 + $0x28] sm:$0xff]   ;;  %v729_v20 = vld [vmem:[%s960_s3 + $0x30] sm:$0xff]   ;;  %v730_v21 = vld [vmem:[%s960_s3 + $0x38] sm:$0xff]  }
  0x19   :  { %666 = vmatprep.mubr.msk.bf16.mxu0 %vm62_vm1, %v52_v10  ;;  %672 = vmatprep.subr.bf16.mxu1 %v724_v12  ;;  %v731_v22 = vld [vmem:[#allocation2] sm:$0xff]   ;;  %v732_v23 = vld [vmem:[#allocation2 + $0x8] sm:$0xff]   ;;  %v733_v24 = vld [vmem:[#allocation2 + $0x10] sm:$0xff]  }
  0x1a   :  { %694 = vmatprep.subr.bf16.mxu0 %v731_v22  ;;  %v734_v25 = vld [vmem:[#allocation2 + $0x18] sm:$0xff]   ;;  %v735_v26 = vld [vmem:[#allocation2 + $0x20] sm:$0xff]   ;;  %v736_v27 = vld [vmem:[#allocation2 + $0x28] sm:$0xff]  }
  0x1b   :  { %695 = vmatpush3.bf16.msra.mxu0 %v731_v22  ;;  %v569_v28 = vld [vmem:[%s959_s2] ss:$0 sm:$0xff]  ;;  %v737_v57 = vld [vmem:[#allocation2 + $0x30] sm:$0xff]   ;;  %v738_v58 = vld [vmem:[#allocation2 + $0x38] sm:$0xff]  }
  0x1c   :  { %673 = vmatpush3.bf16.msra.mxu1 %v724_v12  ;;  %696 = vmatprep.subr.bf16.mxu0 %v732_v23  ;;  %v574_v59 = vld [vmem:[%s961_s4] ss:$0 sm:$0xff] }
  0x1d   :  { %674 = vmatprep.subr.bf16.mxu1 %v725_v15 }
  0x1f   :  { %697 = vmatpush3.bf16.msra.mxu0 %v732_v23 }
  0x20   :  { %667 = vmatmul.mubr.msk.bf16.gmra.mrb[4].mxu0 %vm62_vm1, %v53_v16  ;;  %675 = vmatpush3.bf16.msra.mxu1 %v725_v15 }
  0x21   :  { %676 = vmatprep.subr.bf16.mxu1 %v726_v17  ;;  %698 = vmatprep.subr.bf16.mxu0 %v733_v24 }
  0x23   :  { %699 = vmatpush3.bf16.msra.mxu0 %v733_v24  ;;  %v583_v24 = vld [vmem:[%s963_s6] ss:$0 sm:$0xff]  ;;  %s822_s6 = smov [#allocation5]  }
  0x24   :  { %677 = vmatpush3.bf16.msra.mxu1 %v726_v17  ;;  %700 = vmatprep.subr.bf16.mxu0 %v734_v25  ;;  %s557_s26 = sshll.u32 %s822_s6, 4  ;;  %s558_s26 = int_to_ptr.vmem [resolvable:$true] %s557_s26 }
  0x25   :  { %678 = vmatprep.subr.bf16.mxu1 %v727_v18  ;;  %s793_s27 = scalar_lea.vmem %s558_s26, 512  ;;  %p798_p9 = scmp.lt.s32.totalorder %s558_s26, %s558_s26 }
  0x26   :  { %p794_p8 = scmp.ne.s32.totalorder %s558_s26, %s793_s27  ;;  %p799_p10 = scmp.lt.s32.totalorder %s793_s27, %s793_s27 }
  0x27   :  { %701 = vmatpush3.bf16.msra.mxu0 %v734_v25 }
  0x28   :  { %679 = vmatpush3.bf16.msra.mxu1 %v727_v18  ;;  %702 = vmatprep.subr.bf16.mxu0 %v735_v26  ;;  %p800_p11 = por %p799_p10, %p798_p9 }
  0x29   :  { %680 = vmatprep.subr.bf16.mxu1 %v728_v19 }
  0x2a   :  { %p801_p12 = pnand %p800_p11, %p794_p8 }
  0x2b   :  { %703 = vmatpush3.bf16.msra.mxu0 %v735_v26 }
  0x2c   :  { %681 = vmatpush3.bf16.msra.mxu1 %v728_v19  ;;  %704 = vmatprep.subr.bf16.mxu0 %v736_v27 }
  0x2d   :  { %682 = vmatprep.subr.bf16.mxu1 %v729_v20 }
  0x2f   :  { %705 = vmatpush3.bf16.msra.mxu0 %v736_v27 }
  0x30   :  { %683 = vmatpush3.bf16.msra.mxu1 %v729_v20  ;;  %706 = vmatprep.subr.bf16.mxu0 %v737_v57 }
  0x31   :  { %684 = vmatprep.subr.bf16.mxu1 %v730_v21 }
  0x33   :  { %707 = vmatpush3.bf16.msra.mxu0 %v737_v57 }
  0x34   :  { %685 = vmatpush3.bf16.msra.mxu1 %v730_v21  ;;  %708 = vmatprep.subr.bf16.mxu0 %v738_v58 }
  0x37   :  { %709 = vmatpush3.bf16.msra.mxu0 %v738_v58 }
  0xeb   :  { %v664_v29 = vpop.f32.mrb[0].mxu0 }
  0xec   :  { %v122_v30 = vadd.f32 %v664_v29, %v569_v28  ;;  %v113_v31 = vpop.f32.mrb[1].mxu0 }
  0xed   :  { %v114_v32 = vadd.f32 %v569_v28, %v113_v31  ;;  %v665_v33 = vpop.f32.mrb[2].mxu0 }
  0xee   :  { %v125_v34 = vadd.f32 %v665_v33, %v569_v28  ;;  %v116_v35 = vpop.f32.mrb[3].mxu0  ;;  %v146_v37 = vmax.f32 %v122_v30, 0.0 }
  0xef   :  { %v117_v36 = vadd.f32 %v569_v28, %v116_v35  ;;  %v144_v39 = vmax.f32 %v114_v32, 0.0 }
  0xf0   :  { %v147_v38 = vmax.f32 %v125_v34, 0.0 }
  0xf1   :  { %v145_v40 = vmax.f32 %v117_v36, 0.0 }
  0xf2   :  { %v153_v41 = vpack.c.bf16 %v147_v38, %v146_v37 }
  0xf3   :  { %v668_v42 = vpop.f32.mrb[4].mxu0  ;;  %v152_v43 = vpack.c.bf16 %v145_v40, %v144_v39 }
  0xf4   :  { %v138_v44 = vadd.f32 %v668_v42, %v569_v28  ;;  %v129_v45 = vpop.f32.mrb[5].mxu0 }
  0xf5   :  { %v130_v46 = vadd.f32 %v569_v28, %v129_v45  ;;  %v669_v47 = vpop.f32.mrb[6].mxu0  ;;  %686 = vmatprep.mubr.bf16.mxu1 %v152_v43 }
  0xf6   :  { %v150_v48 = vmax.f32 %v138_v44, 0.0  ;;  %v141_v49 = vadd.f32 %v669_v47, %v569_v28  ;;  %v132_v50 = vpop.f32.mrb[7].mxu0  ;;  %687 = vmatmul.mubr.bf16.vlgmr.msra.gmra.mrb[0].mxu1 %v153_v41 }
  0xf7   :  { %v133_v51 = vadd.f32 %v569_v28, %v132_v50  ;;  %v148_v53 = vmax.f32 %v130_v46, 0.0 }
  0xf8   :  { %v151_v52 = vmax.f32 %v141_v49, 0.0 }
  0xf9   :  { %v149_v54 = vmax.f32 %v133_v51, 0.0 }
  0xfa   :  { %v155_v55 = vpack.c.bf16 %v151_v52, %v150_v48 }
  0xfb   :  { %v154_v56 = vpack.c.bf16 %v149_v54, %v148_v53 }
  0xfd   :  { %690 = vmatprep.mubr.bf16.mxu1 %v154_v56 }
  0xfe   :  { %691 = vmatmul.mubr.bf16.gmra.mrb[4].mxu1 %v155_v55 }
 0x1c9   :  { %v688_v60 = vpop.f32.mrb[0].mxu1 }
 0x1ca   :  { %v270_v61 = vadd.f32 %v688_v60, %v574_v59  ;;  %v261_v62 = vpop.f32.mrb[1].mxu1 }
 0x1cb   :  { %v262_v63 = vadd.f32 %v574_v59, %v261_v62  ;;  %v689_v0 = vpop.f32.mrb[2].mxu1 }
 0x1cc   :  { %v273_v1 = vadd.f32 %v689_v0, %v574_v59  ;;  %v264_v2 = vpop.f32.mrb[3].mxu1  ;;  %v294_v4 = vmax.f32 %v270_v61, 0.0 }
 0x1cd   :  { %v265_v3 = vadd.f32 %v574_v59, %v264_v2  ;;  %v292_v6 = vmax.f32 %v262_v63, 0.0 }
 0x1ce   :  { %v295_v5 = vmax.f32 %v273_v1, 0.0 }
 0x1cf   :  { %v293_v7 = vmax.f32 %v265_v3, 0.0 }
 0x1d0   :  { %v301_v8 = vpack.c.bf16 %v295_v5, %v294_v4 }
 0x1d1   :  { %v300_v9 = vpack.c.bf16 %v293_v7, %v292_v6  ;;  %v692_v10 = vpop.f32.mrb[4].mxu1 }
 0x1d2   :  { %v286_v11 = vadd.f32 %v692_v10, %v574_v59  ;;  %v277_v12 = vpop.f32.mrb[5].mxu1 }
 0x1d3   :  { %v278_v13 = vadd.f32 %v574_v59, %v277_v12  ;;  %v693_v14 = vpop.f32.mrb[6].mxu1  ;;  %710 = vmatprep.mubr.bf16.mxu0 %v300_v9 }
 0x1d4   :  { %v289_v15 = vadd.f32 %v693_v14, %v574_v59  ;;  %v280_v16 = vpop.f32.mrb[7].mxu1  ;;  %711 = vmatmul.mubr.bf16.vlgmr.msra.gmra.mrb[8].mxu0 %v301_v8  ;;  %v298_v18 = vmax.f32 %v286_v11, 0.0 }
 0x1d5   :  { %v281_v17 = vadd.f32 %v574_v59, %v280_v16  ;;  %v296_v20 = vmax.f32 %v278_v13, 0.0 }
 0x1d6   :  { %v299_v19 = vmax.f32 %v289_v15, 0.0 }
 0x1d7   :  { %v297_v21 = vmax.f32 %v281_v17, 0.0 }
 0x1d8   :  { %v303_v22 = vpack.c.bf16 %v299_v19, %v298_v18 }
 0x1d9   :  { %v302_v23 = vpack.c.bf16 %v297_v21, %v296_v20 }
 0x1db   :  { %714 = vmatprep.mubr.bf16.mxu0 %v302_v23 }
 0x1dc   :  { %715 = vmatmul.mubr.bf16.gmra.mrb[12].mxu0 %v303_v22 }
 0x2a7   :  { %v712_v25 = vpop.f32.mrb[8].mxu0 }
 0x2a8   :  { %v418_v26 = vadd.f32 %v712_v25, %v583_v24  ;;  %v409_v27 = vpop.f32.mrb[9].mxu0 }
 0x2a9   :  { %v410_v28 = vadd.f32 %v583_v24, %v409_v27  ;;  %v713_v29 = vpop.f32.mrb[10].mxu0 }
 0x2aa   :  { %444 = vmax.xlane.f32.xlu1 %v418_v26  ;;  %v412_v30 = vpop.f32.mrb[11].mxu0  ;;  %v421_v31 = vadd.f32 %v713_v29, %v583_v24 }
 0x2ab   :  { %440 = vmax.xlane.f32.xlu0 %v410_v28  ;;  %v413_v32 = vadd.f32 %v583_v24, %v412_v30 }
 0x2ae   :  { %446 = vmax.xlane.f32.xlu1 %v421_v31 }
 0x2af   :  { %v716_v33 = vpop.f32.mrb[12].mxu0  ;;  %442 = vmax.xlane.f32.xlu0 %v413_v32 }
 0x2b0   :  { %v425_v34 = vpop.f32.mrb[13].mxu0  ;;  %v434_v39 = vadd.f32 %v716_v33, %v583_v24 }
 0x2b1   :  { %v426_v35 = vadd.f32 %v583_v24, %v425_v34  ;;  %v717_v36 = vpop.f32.mrb[14].mxu0 }
 0x2b2   :  { %v428_v37 = vpop.f32.mrb[15].mxu0  ;;  %v437_v40 = vadd.f32 %v717_v36, %v583_v24 }
 0x2b3   :  { %v429_v38 = vadd.f32 %v583_v24, %v428_v37  ;;  %448 = vmax.xlane.f32.xlu0 %v426_v35 }
 0x2b5   :  { %450 = vmax.xlane.f32.xlu1 %v429_v38 }
 0x2b7   :  { %452 = vmax.xlane.f32.xlu0 %v434_v39 }
 0x2b9   :  { %454 = vmax.xlane.f32.xlu1 %v437_v40 }
 0x337   :  { %v445_v41 = vpop.xlane.xlu1 %444 }
 0x338   :  { %v458_v42 = vsub.f32 %v418_v26, %v445_v41  ;;  %v441_v43 = vpop.xlane.xlu0 %440 }
 0x339   :  { %v456_v44 = vsub.f32 %v410_v28, %v441_v43 }
 0x33a   :  { %v468_v45 = vmul.f32 1.442695, %v458_v42 }
 0x33b   :  { %v464_v46 = vmul.f32 1.442695, %v456_v44  ;;  %v447_v47 = vpop.xlane.xlu1 %446 }
 0x33c   :  { %739 = vpow2.f32 %v468_v45  ;;  %v459_v48 = vsub.f32 %v421_v31, %v447_v47  ;;  %v443_v49 = vpop.xlane.xlu0 %442 }
 0x33d   :  { %v457_v50 = vsub.f32 %v413_v32, %v443_v49  ;;  %741 = vpow2.f32 %v464_v46 }
 0x33e   :  { %v470_v51 = vmul.f32 1.442695, %v459_v48 }
 0x33f   :  { %v466_v52 = vmul.f32 1.442695, %v457_v50 }
 0x340   :  { %743 = vpow2.f32 %v470_v51  ;;  %v449_v53 = vpop.xlane.xlu0 %448 }
 0x341   :  { %v460_v54 = vsub.f32 %v426_v35, %v449_v53  ;;  %745 = vpow2.f32 %v466_v52 }
 0x342   :  { %v451_v55 = vpop.xlane.xlu1 %450 }
 0x343   :  { %v472_v56 = vmul.f32 1.442695, %v460_v54  ;;  %v461_v57 = vsub.f32 %v429_v38, %v451_v55 }
 0x344   :  { %v453_v58 = vpop.xlane.xlu0 %452 }
 0x345   :  { %747 = vpow2.f32 %v472_v56  ;;  %v474_v59 = vmul.f32 1.442695, %v461_v57  ;;  %v462_v60 = vsub.f32 %v434_v39, %v453_v58 }
 0x346   :  { %v740_v61 = vpop.eup %739  ;;  %v455_v62 = vpop.xlane.xlu1 %454 }
 0x347   :  { %749 = vpow2.f32 %v474_v59  ;;  %v476_v63 = vmul.f32 1.442695, %v462_v60  ;;  %v463_v0 = vsub.f32 %v437_v40, %v455_v62  ;;  %484 = vadd.xlane.f32.xlu0 %v740_v61  ;;  %v742_v1 = vpop.eup %741 }
 0x349   :  { %751 = vpow2.f32 %v476_v63  ;;  %v478_v2 = vmul.f32 1.442695, %v463_v0 }
 0x34a   :  { %v744_v3 = vpop.eup %743 }
 0x34b   :  { %753 = vpow2.f32 %v478_v2  ;;  %486 = vadd.xlane.f32.xlu1 %v744_v3  ;;  %480 = vadd.xlane.f32.xlu0 %v742_v1  ;;  %v746_v4 = vpop.eup %745 }
 0x34f   :  { %v748_v5 = vpop.eup %747  ;;  %482 = vadd.xlane.f32.xlu1 %v746_v4 }
 0x350   :  { %488 = vadd.xlane.f32.xlu0 %v748_v5 }
 0x351   :  { %v750_v6 = vpop.eup %749 }
 0x353   :  { %v752_v7 = vpop.eup %751  ;;  %490 = vadd.xlane.f32.xlu1 %v750_v6 }
 0x354   :  { %492 = vadd.xlane.f32.xlu0 %v752_v7 }
 0x355   :  { %v754_v8 = vpop.eup %753 }
 0x357   :  { %494 = vadd.xlane.f32.xlu1 %v754_v8 }
 0x3d4   :  { %v485_v9 = vpop.xlane.xlu0 %484 }
 0x3d5   :  { %755 = vrcp.f32 %v485_v9 }
 0x3d8   :  { %v487_v10 = vpop.xlane.xlu1 %486  ;;  %v481_v11 = vpop.xlane.xlu0 %480 }
 0x3d9   :  { %757 = vrcp.f32 %v487_v10 }
 0x3da   :  { %759 = vrcp.f32 %v481_v11 }
 0x3dc   :  { %v483_v12 = vpop.xlane.xlu1 %482 }
 0x3dd   :  { %761 = vrcp.f32 %v483_v12  ;;  %v489_v13 = vpop.xlane.xlu0 %488 }
 0x3de   :  { %763 = vrcp.f32 %v489_v13 }
 0x3df   :  { %v756_v15 = vpop.eup %755 }
 0x3e0   :  { %v491_v14 = vpop.xlane.xlu1 %490  ;;  %v501_v18 = vmul.f32 %v756_v15, %v740_v61 }
 0x3e1   :  { %765 = vrcp.f32 %v491_v14  ;;  %v493_v16 = vpop.xlane.xlu0 %492 }
 0x3e2   :  { %767 = vrcp.f32 %v493_v16 }
 0x3e3   :  { %v758_v17 = vpop.eup %757 }
 0x3e4   :  { %v503_v19 = vmul.f32 %v758_v17, %v744_v3  ;;  %v495_v20 = vpop.xlane.xlu1 %494  ;;  %v760_v21 = vpop.eup %759 }
 0x3e5   :  { %769 = vrcp.f32 %v495_v20  ;;  %v497_v24 = vmul.f32 %v760_v21, %v742_v1 }
 0x3e6   :  { %v616_v22 = vpack.c.bf16 %v503_v19, %v501_v18 }
 0x3e7   :  { %v762_v23 = vpop.eup %761 }
 0x3e8   :  { %v499_v25 = vmul.f32 %v762_v23, %v746_v4  ;;  %628 = vst [vmem:[#allocation5 + $0x8] sm:$0xff] %v616_v22   ;;  %v764_v26 = vpop.eup %763 }
 0x3e9   :  { %v505_v29 = vmul.f32 %v764_v26, %v748_v5 }
 0x3ea   :  { %v611_v27 = vpack.c.bf16 %v499_v25, %v497_v24 }
 0x3eb   :  { %v766_v28 = vpop.eup %765 }
 0x3ec   :  { %v507_v30 = vmul.f32 %v766_v28, %v750_v6  ;;  %612 = vst [vmem:[#allocation5] sm:$0xff] %v611_v27   ;;  %v768_v31 = vpop.eup %767 }
 0x3ed   :  { %v509_v34 = vmul.f32 %v768_v31, %v752_v7 }
 0x3ee   :  { %v621_v32 = vpack.c.bf16 %v507_v30, %v505_v29 }
 0x3ef   :  { %v770_v33 = vpop.eup %769 }
 0x3f0   :  { %v511_v35 = vmul.f32 %v770_v33, %v754_v8  ;;  %629 = vst [vmem:[#allocation5 + $0x10] sm:$0xff] %v621_v32  }
 0x3f2   :  { %v626_v36 = vpack.c.bf16 %v511_v35, %v509_v34 }
 0x3f4   :  { %630 = vst [vmem:[#allocation5 + $0x18] sm:$0xff] %v626_v36  }
 0x3f5   :  { %804 = shalt.err (!%p801_p12)
}
 0x3f6   :  { %s805_s30 = scalar_lea.hbm %s964_s7, 512 }
 0x3f7   :  { %p806_p13 = scmp.ne.s32.totalorder %s964_s7, %s805_s30  ;;  %p809_p0 = scmp.lt.u32.totalorder %s805_s30, %s964_s7 }
 0x3f9   :  { %p811_p1 = pnand %p809_p0, %p806_p13 }
 0x3fb   :  { %814 = shalt.err (!%p811_p1)
}
 0x3fc   :  { %563 = dma.vmem_to_hbm [thread:$0]  %s558_s26, 512, %s964_s7, [#allocation4], %s820_s11, %s820_s11, %s821_s12  }
 0x3fd   :  { %817 = dma.done.wait [#allocation4], 512  }
 0x3fe   :  { %818 = vsyncadd [#allocation4], 4294966784 }
 0x3ff   :  { %567 = vsyncpa [#allocation3], 1 }
 0x400   :  { %568 = vsyncpa [#allocation4], 1 }

</bundles_post_ra>
